<compile_context>
chip_gen: v7x
topology: tpu7x:2x2x1
jax: 0.10.0
libtpu: 0.0.40
codegen_flags: <defaults>
</compile_context>

<pallas_src>
import functools

import jax
import jax.numpy as jnp
from jax.experimental import pallas as pl
from jax.experimental.pallas import tpu as pltpu

N_STEPS = 100
W_HID = 16   # "w" in the PyTorch module
T_W = 1      # "t_w" in the PyTorch module
assert T_W == 1, "kernel folds the width-1 temb path into lane broadcasts"


# ----------------------------------------------------------------------------
# Pallas kernel: whole forward pass for one lane-dense batch tile (tm samples).
#   tscal  : (4,) SMEM      [wt1, bt1, wt2, bt2]  (the two 1x1 t_layer Linears)
#   xin_ref: (4, tm)  f32   rows 0:1 = x^T, row 2 = t (float), row 3 = 0
#   w_ref  : (7,16,16) bf16 W^T slabs: [W11x|0|w11t|0], W12, W21, W22, W31h, W32, [Wl|0]
#   b_ref  : (16, 8)  f32   cols: b11 b12 b21 b22 b31 b32 w31t^T [bl|0]
#   o_ref  : (2, tm)  f32   prediction^T
# ----------------------------------------------------------------------------
def noise_model_kernel(n_steps, tscal_ref, xin_ref, w_ref, b_ref, o_ref):
    relu = lambda v: jnp.maximum(v, 0.0)
    f32 = jnp.float32
    bf16 = jnp.bfloat16

    xin = xin_ref[...]                                   # (4, tm) f32

    # --- time embedding (T_W == 1: both Linears are scalar FMAs from SMEM) ---
    t = xin[2:3, :] * (1.0 / n_steps) - 0.5              # (1, tm)
    temb = relu(t * tscal_ref[0] + tscal_ref[1])
    temb = relu(temb * tscal_ref[2] + tscal_ref[3])      # (1, tm) f32

    def bcol(i):                                         # (16, 1) bias/aux column
        return b_ref[:, i:i + 1]

    # --- layer1: concat([x, temb]) @ W11 folded into ONE matmul --------------
    # operand rows: [x0, x1, t_raw (weight column is zero), temb]
    op1 = jnp.concatenate([xin[0:3, :], temb], axis=0).astype(bf16)        # (4, tm)
    h = jnp.dot(w_ref[0, :, 0:4], op1, preferred_element_type=f32)         # (16, tm)
    h = relu(h + bcol(0))
    h = relu(jnp.dot(w_ref[1, :, :], h.astype(bf16),
                     preferred_element_type=f32) + bcol(1))

    # --- layer2 ---------------------------------------------------------------
    h = relu(jnp.dot(w_ref[2, :, :], h.astype(bf16),
                     preferred_element_type=f32) + bcol(2))
    h = relu(jnp.dot(w_ref[3, :, :], h.astype(bf16),
                     preferred_element_type=f32) + bcol(3))

    # --- layer3: concat([h, temb]) @ W31 == W31h^T @ h + w31t^T (x) temb ------
    h = jnp.dot(w_ref[4, :, :], h.astype(bf16), preferred_element_type=f32)
    h = relu(h + bcol(6) * temb + bcol(4))
    h = jnp.tanh(jnp.dot(w_ref[5, :, :], h.astype(bf16),
                         preferred_element_type=f32) + bcol(5))

    # --- last layer: true (2,16) weight, (2, tm) result, direct store ---------
    out = jnp.dot(w_ref[6, 0:2, :], h.astype(bf16), preferred_element_type=f32)
    o_ref[...] = out + b_ref[0:2, 7:8]


# ----------------------------------------------------------------------------
# Parameter setup (PyTorch-style (in, out) weights) + packing into slabs.
# ----------------------------------------------------------------------------
def init_params(key):
    """Deterministic synthetic parameters, stored as (in_features, out_features)."""
    def lin(k, fin, fout):
        kw, kb = jax.random.split(k)
        scale = 1.0 / jnp.sqrt(fin)
        w = jax.random.uniform(kw, (fin, fout), jnp.float32, -scale, scale)
        b = jax.random.uniform(kb, (1, fout), jnp.float32, -scale, scale)
        return w, b

    keys = jax.random.split(key, 9)
    wt1, bt1 = lin(keys[0], 1, T_W)              # t_layer[0]
    wt2, bt2 = lin(keys[1], T_W, T_W)            # t_layer[2]
    w11, b11 = lin(keys[2], T_W + 2, W_HID)      # layer1[0]  (3, 16)
    w12, b12 = lin(keys[3], W_HID, W_HID)        # layer1[2]
    w21, b21 = lin(keys[4], W_HID, W_HID)        # layer2[0]
    w22, b22 = lin(keys[5], W_HID, W_HID)        # layer2[2]
    w31, b31 = lin(keys[6], W_HID + T_W, W_HID)  # layer3[0]  (17, 16)
    w32, b32 = lin(keys[7], W_HID, W_HID)        # layer3[2]
    wl, bl = lin(keys[8], W_HID, 2)              # last_layer

    # Split concat weights: first rows act on x / h, last T_W row(s) act on temb.
    return dict(
        wt1=wt1, bt1=bt1, wt2=wt2, bt2=bt2,
        w11x=w11[:2], w11t=w11[2:], b11=b11, w12=w12, b12=b12,
        w21=w21, b21=b21, w22=w22, b22=b22,
        w31h=w31[:W_HID], w31t=w31[W_HID:], b31=b31, w32=w32, b32=b32,
        wl=wl, bl=bl,
    )


def pack_params(params):
    f32 = jnp.float32

    # Weight slab: 7 transposed matmul weights, zero-padded to (16, 16), bf16.
    W = jnp.zeros((7, W_HID, W_HID), f32)
    W = W.at[0, :, 0:2].set(params["w11x"].T)    # x part of layer-1 concat weight
    W = W.at[0, :, 3].set(params["w11t"][0])     # temb column (operand row 3 = temb)
    W = W.at[1].set(params["w12"].T)
    W = W.at[2].set(params["w21"].T)
    W = W.at[3].set(params["w22"].T)
    W = W.at[4].set(params["w31h"].T)
    W = W.at[5].set(params["w32"].T)
    W = W.at[6, 0:2, :].set(params["wl"].T)      # rows 2:15 unused
    W = W.astype(jnp.bfloat16)

    # Bias / aux slab (f32 -> VPU math stays f32).
    B = jnp.zeros((W_HID, 8), f32)
    B = B.at[:, 0].set(params["b11"][0])
    B = B.at[:, 1].set(params["b12"][0])
    B = B.at[:, 2].set(params["b21"][0])
    B = B.at[:, 3].set(params["b22"][0])
    B = B.at[:, 4].set(params["b31"][0])
    B = B.at[:, 5].set(params["b32"][0])
    B = B.at[:, 6].set(params["w31t"][0])
    B = B.at[:2, 7].set(params["bl"][0])

    # The two 1x1 t_layer Linears are true scalars -> SMEM.
    tscal = jnp.stack([params["wt1"][0, 0], params["bt1"][0, 0],
                       params["wt2"][0, 0], params["bt2"][0, 0]]).astype(f32)
    return W, B, tscal


# ----------------------------------------------------------------------------
# Wrapper: input packing (feature-major) + pallas_call plumbing.
# ----------------------------------------------------------------------------
def _num_tensorcores():
    """2 TensorCores only on v7x; v5e/v6e are single-TC."""
    try:
        kind = jax.devices()[0].device_kind.lower()
        if "v7" in kind:
            return 2
    except Exception:
        pass
    return 1


def noise_model_forward(x, t, params, n_steps=N_STEPS, tm=None):
    n = x.shape[0]
    if tm is None:
        n_cores = _num_tensorcores()
        # Single big tile on single-TC chips; even 2-way split on v7x.
        target = pl.cdiv(n, n_cores) if n_cores > 1 else n
        tm = min(8192, max(128, pl.next_power_of_2(max(int(target), 1))))
    n_pad = pl.cdiv(n, tm) * tm
    grid = (n_pad // tm,)

    # Pack x and t into one slim feature-major slab (batch on the lane axis).
    xin = jnp.zeros((4, n_pad), jnp.float32)
    xin = xin.at[0:2, :n].set(x.T.astype(jnp.float32))
    xin = xin.at[2, :n].set(t[:, 0].astype(jnp.float32))

    w_slab, b_slab, tscal = pack_params(params)

    out2 = pl.pallas_call(
        functools.partial(noise_model_kernel, float(n_steps)),
        out_shape=jax.ShapeDtypeStruct((2, n_pad), jnp.float32),
        grid_spec=pltpu.PrefetchScalarGridSpec(
            num_scalar_prefetch=0,
            grid=grid,
            in_specs=[
                pl.BlockSpec(memory_space=pltpu.MemorySpace.SMEM),      # tscal (4,)
                pl.BlockSpec((4, tm), lambda i: (0, i)),                # packed x/t
                pl.BlockSpec((7, W_HID, W_HID), lambda i: (0, 0, 0)),   # weights (bf16)
                pl.BlockSpec((W_HID, 8), lambda i: (0, 0)),             # biases/aux
            ],
            out_specs=pl.BlockSpec((2, tm), lambda i: (0, i)),
        ),
        compiler_params=pltpu.CompilerParams(
            dimension_semantics=("parallel",)),
    )(tscal, xin, w_slab, b_slab)

    # Undo the feature-major layout for the caller: [N, 2].
    return out2[:, :n].T


# ----------------------------------------------------------------------------
# Pure-JAX reference (mirrors the PyTorch forward) for correctness checking.
# ----------------------------------------------------------------------------
def noise_model_ref(x, t, params, n_steps=N_STEPS):
    relu = lambda v: jnp.maximum(v, 0.0)
    tf = t.astype(jnp.float32) / n_steps - 0.5
    temb = relu(tf @ params["wt1"] + params["bt1"])
    temb = relu(temb @ params["wt2"] + params["bt2"])
    w11 = jnp.concatenate([params["w11x"], params["w11t"]], axis=0)
    h = relu(jnp.concatenate([x, temb], axis=-1) @ w11 + params["b11"])
    h = relu(h @ params["w12"] + params["b12"])
    h = relu(h @ params["w21"] + params["b21"])
    h = relu(h @ params["w22"] + params["b22"])
    w31 = jnp.concatenate([params["w31h"], params["w31t"]], axis=0)
    h = relu(jnp.concatenate([h, temb], axis=-1) @ w31 + params["b31"])
    h = jnp.tanh(h @ params["w32"] + params["b32"])
    return h @ params["wl"] + params["bl"]


if __name__ == "__main__":
    key = jax.random.PRNGKey(0)
    k_param, k_x, k_t = jax.random.split(key, 3)

    params = init_params(k_param)

    n = 512  # batch of 2-D points (DDPM on a 2-D toy distribution)
    x = jax.random.normal(k_x, (n, 2), jnp.float32)
    t = jax.random.randint(k_t, (n, 1), 0, N_STEPS, jnp.int32)

    out = noise_model_forward(x, t, params)
    out = jax.block_until_ready(out)

    ref = noise_model_ref(x, t, params)
    assert out.shape == (n, 2)
    # bf16 MXU operands -> relaxed tolerance vs the f32 reference.
    err = float(jnp.max(jnp.abs(out - ref)))
    assert jnp.allclose(out, ref, atol=3e-2, rtol=3e-2), f"mismatch vs ref (max err {err})"

    print("KERNEL_OK")
</pallas_src>

<mosaic_0001>
module attributes {stable_mosaic.version = 11 : i64} {
  func.func @noise_model_kernel(%arg0: i32, %arg1: memref<4xf32, #tpu.memory_space<smem>>, %arg2: memref<4x512xf32, #tpu.memory_space<vmem>>, %arg3: memref<7x16x16xbf16, #tpu.memory_space<vmem>>, %arg4: memref<16x8xf32, #tpu.memory_space<vmem>>, %arg5: memref<2x512xf32, #tpu.memory_space<vmem>>) attributes {dimension_semantics = [#tpu.dimension_semantics<parallel>], iteration_bounds = array<i64: 1>, scalar_prefetch = 0 : i64, scratch_operands = 0 : i64, tpu.core_type = #tpu.core_type<tc>, window_params = [{transform_indices = @transform_0, window_bounds = array<i64: 4>}, {transform_indices = @transform_1, window_bounds = array<i64: 4, 512>}, {pipeline_mode = #tpu.pipeline_mode<synchronous>, transform_indices = @transform_2, window_bounds = array<i64: 7, 16, 16>}, {pipeline_mode = #tpu.pipeline_mode<synchronous>, transform_indices = @transform_3, window_bounds = array<i64: 16, 8>}, {transform_indices = @transform_4, window_bounds = array<i64: 2, 512>}]} {
    %c0 = arith.constant 0 : index
    %c0_0 = arith.constant 0 : index
    %0 = vector.load %arg2[%c0, %c0_0] : memref<4x512xf32, #tpu.memory_space<vmem>>, vector<4x512xf32>
    %1 = vector.extract_strided_slice %0 {offsets = [2, 0], sizes = [1, 512], strides = [1, 1]} : vector<4x512xf32> to vector<1x512xf32>
    %cst = arith.constant 0.00999999977 : f32
    %2 = vector.broadcast %cst : f32 to vector<1x512xf32>
    %3 = arith.mulf %1, %2 : vector<1x512xf32>
    %cst_1 = arith.constant 5.000000e-01 : f32
    %4 = vector.broadcast %cst_1 : f32 to vector<1x512xf32>
    %5 = arith.subf %3, %4 : vector<1x512xf32>
    %c0_2 = arith.constant 0 : index
    %6 = memref.load %arg1[%c0_2] : memref<4xf32, #tpu.memory_space<smem>>
    %7 = vector.broadcast %6 : f32 to vector<1x512xf32>
    %8 = arith.mulf %5, %7 : vector<1x512xf32>
    %c1 = arith.constant 1 : index
    %9 = memref.load %arg1[%c1] : memref<4xf32, #tpu.memory_space<smem>>
    %10 = vector.broadcast %9 : f32 to vector<1x512xf32>
    %11 = arith.addf %8, %10 : vector<1x512xf32>
    %cst_3 = arith.constant 0.000000e+00 : f32
    %12 = vector.broadcast %cst_3 : f32 to vector<1x512xf32>
    %13 = arith.maximumf %11, %12 : vector<1x512xf32>
    %c2 = arith.constant 2 : index
    %14 = memref.load %arg1[%c2] : memref<4xf32, #tpu.memory_space<smem>>
    %15 = vector.broadcast %14 : f32 to vector<1x512xf32>
    %16 = arith.mulf %13, %15 : vector<1x512xf32>
    %c3 = arith.constant 3 : index
    %17 = memref.load %arg1[%c3] : memref<4xf32, #tpu.memory_space<smem>>
    %18 = vector.broadcast %17 : f32 to vector<1x512xf32>
    %19 = arith.addf %16, %18 : vector<1x512xf32>
    %cst_4 = arith.constant 0.000000e+00 : f32
    %20 = vector.broadcast %cst_4 : f32 to vector<1x512xf32>
    %21 = arith.maximumf %19, %20 : vector<1x512xf32>
    %22 = vector.extract_strided_slice %0 {offsets = [0, 0], sizes = [3, 512], strides = [1, 1]} : vector<4x512xf32> to vector<3x512xf32>
    %23 = tpu.concatenate %22, %21 in 0 : vector<3x512xf32>, vector<1x512xf32> -> vector<4x512xf32>
    %24 = arith.truncf %23 : vector<4x512xf32> to vector<4x512xbf16>
    %c0_5 = arith.constant 0 : index
    %c0_6 = arith.constant 0 : index
    %c0_7 = arith.constant 0 : index
    %25 = vector.load %arg3[%c0_5, %c0_6, %c0_7] : memref<7x16x16xbf16, #tpu.memory_space<vmem>>, vector<1x16x4xbf16>
    %26 = vector.shape_cast %25 : vector<1x16x4xbf16> to vector<16x4xbf16>
    %cst_8 = arith.constant dense<0.000000e+00> : vector<16x512xf32>
    %27 = tpu.matmul %26, %24, %cst_8 {dimension_numbers = #tpu.dot_dimension_numbers<[1], [0], [0], [1], [0, 0, 1, 1], [], []>} : vector<16x4xbf16>, vector<4x512xbf16>, vector<16x512xf32> -> vector<16x512xf32>
    %c0_9 = arith.constant 0 : index
    %c0_10 = arith.constant 0 : index
    %28 = vector.load %arg4[%c0_9, %c0_10] : memref<16x8xf32, #tpu.memory_space<vmem>>, vector<16x1xf32>
    %29 = vector.broadcast %28 : vector<16x1xf32> to vector<16x512xf32>
    %30 = arith.addf %27, %29 : vector<16x512xf32>
    %cst_11 = arith.constant 0.000000e+00 : f32
    %31 = vector.broadcast %cst_11 : f32 to vector<16x512xf32>
    %32 = arith.maximumf %30, %31 : vector<16x512xf32>
    %c1_12 = arith.constant 1 : index
    %c0_13 = arith.constant 0 : index
    %c0_14 = arith.constant 0 : index
    %33 = vector.load %arg3[%c1_12, %c0_13, %c0_14] : memref<7x16x16xbf16, #tpu.memory_space<vmem>>, vector<1x16x16xbf16>
    %34 = vector.shape_cast %33 : vector<1x16x16xbf16> to vector<16x16xbf16>
    %35 = arith.truncf %32 : vector<16x512xf32> to vector<16x512xbf16>
    %cst_15 = arith.constant dense<0.000000e+00> : vector<16x512xf32>
    %36 = tpu.matmul %34, %35, %cst_15 {dimension_numbers = #tpu.dot_dimension_numbers<[1], [0], [0], [1], [0, 0, 1, 1], [], []>} : vector<16x16xbf16>, vector<16x512xbf16>, vector<16x512xf32> -> vector<16x512xf32>
    %c0_16 = arith.constant 0 : index
    %c1_17 = arith.constant 1 : index
    %37 = vector.load %arg4[%c0_16, %c1_17] : memref<16x8xf32, #tpu.memory_space<vmem>>, vector<16x1xf32>
    %38 = vector.broadcast %37 : vector<16x1xf32> to vector<16x512xf32>
    %39 = arith.addf %36, %38 : vector<16x512xf32>
    %cst_18 = arith.constant 0.000000e+00 : f32
    %40 = vector.broadcast %cst_18 : f32 to vector<16x512xf32>
    %41 = arith.maximumf %39, %40 : vector<16x512xf32>
    %c2_19 = arith.constant 2 : index
    %c0_20 = arith.constant 0 : index
    %c0_21 = arith.constant 0 : index
    %42 = vector.load %arg3[%c2_19, %c0_20, %c0_21] : memref<7x16x16xbf16, #tpu.memory_space<vmem>>, vector<1x16x16xbf16>
    %43 = vector.shape_cast %42 : vector<1x16x16xbf16> to vector<16x16xbf16>
    %44 = arith.truncf %41 : vector<16x512xf32> to vector<16x512xbf16>
    %cst_22 = arith.constant dense<0.000000e+00> : vector<16x512xf32>
    %45 = tpu.matmul %43, %44, %cst_22 {dimension_numbers = #tpu.dot_dimension_numbers<[1], [0], [0], [1], [0, 0, 1, 1], [], []>} : vector<16x16xbf16>, vector<16x512xbf16>, vector<16x512xf32> -> vector<16x512xf32>
    %c0_23 = arith.constant 0 : index
    %c2_24 = arith.constant 2 : index
    %46 = vector.load %arg4[%c0_23, %c2_24] : memref<16x8xf32, #tpu.memory_space<vmem>>, vector<16x1xf32>
    %47 = vector.broadcast %46 : vector<16x1xf32> to vector<16x512xf32>
    %48 = arith.addf %45, %47 : vector<16x512xf32>
    %cst_25 = arith.constant 0.000000e+00 : f32
    %49 = vector.broadcast %cst_25 : f32 to vector<16x512xf32>
    %50 = arith.maximumf %48, %49 : vector<16x512xf32>
    %c3_26 = arith.constant 3 : index
    %c0_27 = arith.constant 0 : index
    %c0_28 = arith.constant 0 : index
    %51 = vector.load %arg3[%c3_26, %c0_27, %c0_28] : memref<7x16x16xbf16, #tpu.memory_space<vmem>>, vector<1x16x16xbf16>
    %52 = vector.shape_cast %51 : vector<1x16x16xbf16> to vector<16x16xbf16>
    %53 = arith.truncf %50 : vector<16x512xf32> to vector<16x512xbf16>
    %cst_29 = arith.constant dense<0.000000e+00> : vector<16x512xf32>
    %54 = tpu.matmul %52, %53, %cst_29 {dimension_numbers = #tpu.dot_dimension_numbers<[1], [0], [0], [1], [0, 0, 1, 1], [], []>} : vector<16x16xbf16>, vector<16x512xbf16>, vector<16x512xf32> -> vector<16x512xf32>
    %c0_30 = arith.constant 0 : index
    %c3_31 = arith.constant 3 : index
    %55 = vector.load %arg4[%c0_30, %c3_31] : memref<16x8xf32, #tpu.memory_space<vmem>>, vector<16x1xf32>
    %56 = vector.broadcast %55 : vector<16x1xf32> to vector<16x512xf32>
    %57 = arith.addf %54, %56 : vector<16x512xf32>
    %cst_32 = arith.constant 0.000000e+00 : f32
    %58 = vector.broadcast %cst_32 : f32 to vector<16x512xf32>
    %59 = arith.maximumf %57, %58 : vector<16x512xf32>
    %c4 = arith.constant 4 : index
    %c0_33 = arith.constant 0 : index
    %c0_34 = arith.constant 0 : index
    %60 = vector.load %arg3[%c4, %c0_33, %c0_34] : memref<7x16x16xbf16, #tpu.memory_space<vmem>>, vector<1x16x16xbf16>
    %61 = vector.shape_cast %60 : vector<1x16x16xbf16> to vector<16x16xbf16>
    %62 = arith.truncf %59 : vector<16x512xf32> to vector<16x512xbf16>
    %cst_35 = arith.constant dense<0.000000e+00> : vector<16x512xf32>
    %63 = tpu.matmul %61, %62, %cst_35 {dimension_numbers = #tpu.dot_dimension_numbers<[1], [0], [0], [1], [0, 0, 1, 1], [], []>} : vector<16x16xbf16>, vector<16x512xbf16>, vector<16x512xf32> -> vector<16x512xf32>
    %c0_36 = arith.constant 0 : index
    %c6 = arith.constant 6 : index
    %64 = vector.load %arg4[%c0_36, %c6] : memref<16x8xf32, #tpu.memory_space<vmem>>, vector<16x1xf32>
    %65 = vector.broadcast %64 : vector<16x1xf32> to vector<16x512xf32>
    %66 = vector.broadcast %21 : vector<1x512xf32> to vector<16x512xf32>
    %67 = arith.mulf %65, %66 : vector<16x512xf32>
    %68 = arith.addf %63, %67 : vector<16x512xf32>
    %c0_37 = arith.constant 0 : index
    %c4_38 = arith.constant 4 : index
    %69 = vector.load %arg4[%c0_37, %c4_38] : memref<16x8xf32, #tpu.memory_space<vmem>>, vector<16x1xf32>
    %70 = vector.broadcast %69 : vector<16x1xf32> to vector<16x512xf32>
    %71 = arith.addf %68, %70 : vector<16x512xf32>
    %cst_39 = arith.constant 0.000000e+00 : f32
    %72 = vector.broadcast %cst_39 : f32 to vector<16x512xf32>
    %73 = arith.maximumf %71, %72 : vector<16x512xf32>
    %c5 = arith.constant 5 : index
    %c0_40 = arith.constant 0 : index
    %c0_41 = arith.constant 0 : index
    %74 = vector.load %arg3[%c5, %c0_40, %c0_41] : memref<7x16x16xbf16, #tpu.memory_space<vmem>>, vector<1x16x16xbf16>
    %75 = vector.shape_cast %74 : vector<1x16x16xbf16> to vector<16x16xbf16>
    %76 = arith.truncf %73 : vector<16x512xf32> to vector<16x512xbf16>
    %cst_42 = arith.constant dense<0.000000e+00> : vector<16x512xf32>
    %77 = tpu.matmul %75, %76, %cst_42 {dimension_numbers = #tpu.dot_dimension_numbers<[1], [0], [0], [1], [0, 0, 1, 1], [], []>} : vector<16x16xbf16>, vector<16x512xbf16>, vector<16x512xf32> -> vector<16x512xf32>
    %c0_43 = arith.constant 0 : index
    %c5_44 = arith.constant 5 : index
    %78 = vector.load %arg4[%c0_43, %c5_44] : memref<16x8xf32, #tpu.memory_space<vmem>>, vector<16x1xf32>
    %79 = vector.broadcast %78 : vector<16x1xf32> to vector<16x512xf32>
    %80 = arith.addf %77, %79 : vector<16x512xf32>
    %81 = math.tanh %80 : vector<16x512xf32>
    %c6_45 = arith.constant 6 : index
    %c0_46 = arith.constant 0 : index
    %c0_47 = arith.constant 0 : index
    %82 = vector.load %arg3[%c6_45, %c0_46, %c0_47] : memref<7x16x16xbf16, #tpu.memory_space<vmem>>, vector<1x2x16xbf16>
    %83 = vector.shape_cast %82 : vector<1x2x16xbf16> to vector<2x16xbf16>
    %84 = arith.truncf %81 : vector<16x512xf32> to vector<16x512xbf16>
    %cst_48 = arith.constant dense<0.000000e+00> : vector<2x512xf32>
    %85 = tpu.matmul %83, %84, %cst_48 {dimension_numbers = #tpu.dot_dimension_numbers<[1], [0], [0], [1], [0, 0, 1, 1], [], []>} : vector<2x16xbf16>, vector<16x512xbf16>, vector<2x512xf32> -> vector<2x512xf32>
    %c0_49 = arith.constant 0 : index
    %c7 = arith.constant 7 : index
    %86 = vector.load %arg4[%c0_49, %c7] : memref<16x8xf32, #tpu.memory_space<vmem>>, vector<2x1xf32>
    %87 = vector.broadcast %86 : vector<2x1xf32> to vector<2x512xf32>
    %88 = arith.addf %85, %87 : vector<2x512xf32>
    %c0_50 = arith.constant 0 : index
    %c0_51 = arith.constant 0 : index
    %89 = vector.load %arg5[%c0_50, %c0_51] : memref<2x512xf32, #tpu.memory_space<vmem>>, vector<2x512xf32>
    tpu.vector_store %arg5[%c0_50, %c0_51], %88 {strides = array<i32>} : memref<2x512xf32, #tpu.memory_space<vmem>>, vector<2x512xf32>,
    return
  }
  func.func @transform_0(%arg0: i32) -> i32 {
    %c0_i32 = arith.constant 0 : i32
    %c0_i32_0 = arith.constant 0 : i32
    return %c0_i32 : i32
  }
  func.func @transform_1(%arg0: i32) -> (i32, i32) {
    %c0_i32 = arith.constant 0 : i32
    %c0_i32_0 = arith.constant 0 : i32
    return %c0_i32, %arg0 : i32, i32
  }
  func.func @transform_2(%arg0: i32) -> (i32, i32, i32) {
    %c0_i32 = arith.constant 0 : i32
    %c0_i32_0 = arith.constant 0 : i32
    %c0_i32_1 = arith.constant 0 : i32
    %c0_i32_2 = arith.constant 0 : i32
    return %c0_i32, %c0_i32_0, %c0_i32_1 : i32, i32, i32
  }
  func.func @transform_3(%arg0: i32) -> (i32, i32) {
    %c0_i32 = arith.constant 0 : i32
    %c0_i32_0 = arith.constant 0 : i32
    %c0_i32_1 = arith.constant 0 : i32
    return %c0_i32, %c0_i32_0 : i32, i32
  }
  func.func @transform_4(%arg0: i32) -> (i32, i32) {
    %c0_i32 = arith.constant 0 : i32
    %c0_i32_0 = arith.constant 0 : i32
    return %c0_i32, %arg0 : i32, i32
  }
}

</mosaic_0001>

<bundles_post_ra>
// kernel: tpu_custom_call.1
= control target key start
LH: loop header
LB: loop body
LE: loop exit
PB: predicated region body
PF: predicated region fallthrough
CT: control target
= control target key end

     0   :  { %9 = vsyncpa [#allocation5], 0  ;;  %s1296_s0 = inlined_call_operand.vmem [shape: f32[4], index: 0, kind: input, shape index: {}]   ;;  %s1297_s1 = inlined_call_operand.vmem [shape: f32[4,512], index: 1, kind: input, shape index: {}]   ;;  %s1298_s2 = inlined_call_operand.hbm [shape: bf16[7,16,16], index: 2, kind: input, shape index: {}]   ;;  %s1299_s3 = inlined_call_operand.vmem [shape: f32[16,8], index: 3, kind: input, shape index: {}]   ;;  %s1300_s4 = inlined_call_operand.hbm [shape: f32[2,512], index: 4, kind: output, shape index: {}]  }
   0x1   :  { %10 = vsyncpa [#allocation3], 0 }
   0x2   :  { %11 = vsyncpa [#allocation4], 0  ;;  %s18_s17 = sshll.u32 %s1296_s0, 4  ;;  %s19_s17 = int_to_ptr.vmem [resolvable:$true] %s18_s17 }
   0x3   :  { %s1079_s18 = scalar_lea.vmem %s19_s17, 16  ;;  %p1084_p1 = scmp.lt.s32.totalorder %s19_s17, %s19_s17 }
   0x4   :  { %p1080_p0 = scmp.ne.s32.totalorder %s19_s17, %s1079_s18  ;;  %p1085_p2 = scmp.lt.s32.totalorder %s1079_s18, %s1079_s18 }
   0x6   :  { %p1086_p3 = por %p1085_p2, %p1084_p1 }
   0x8   :  { %p1087_p4 = pnand %p1086_p3, %p1080_p0 }
   0xa   :  { %1090 = shalt.err (!%p1087_p4)
}
   0xb   :  { %s1141_s19 = smov [#allocation2]   ;;  %s1142_s20 = smov [#allocation6]  }
   0xc   :  { %21 = dma.vmem_to_smem %s19_s17, 16, %s1141_s19, [#allocation5]  }
   0xd   :  { %s29_s21 = sshll.u32 %s1142_s20, 4  ;;  %s1091_s24 = scalar_lea.hbm %s1298_s2, 896  ;;  %s30_s21 = int_to_ptr.vmem [resolvable:$true] %s29_s21 }
   0xe   :  { %p1092_p5 = scmp.ne.s32.totalorder %s1298_s2, %s1091_s24  ;;  %p1095_p6 = scmp.lt.u32.totalorder %s1091_s24, %s1298_s2 }
  0x10   :  { %p1097_p7 = pnand %p1095_p6, %p1092_p5 }
  0x12   :  { %1100 = shalt.err (!%p1097_p7)
}
  0x13   :  { %s1101_s28 = scalar_lea.vmem %s30_s21, 896  ;;  %p1106_p9 = scmp.lt.s32.totalorder %s30_s21, %s30_s21 }
  0x14   :  { %p1102_p8 = scmp.ne.s32.totalorder %s30_s21, %s1101_s28  ;;  %p1107_p10 = scmp.lt.s32.totalorder %s1101_s28, %s1101_s28 }
  0x16   :  { %p1108_p11 = por %p1107_p10, %p1106_p9 }
  0x18   :  { %p1109_p12 = pnand %p1108_p11, %p1102_p8 }
  0x1a   :  { %1112 = shalt.err (!%p1109_p12)
}
  0x1b   :  { %s1143_s29 = smov 64   ;;  %s1144_s30 = smov 4  }
  0x1c   :  { %35 = dma.hbm_to_vmem [thread:$0]  %s1298_s2, 896, %s30_s21, [#allocation3], %s1143_s29, %s1143_s29, %s1144_s30  }
  0x1d   :  { %1135 = dma.done.wait [#allocation5], 16  }
  0x1e   :  { %1136 = vsyncadd [#allocation5], 4294967280 }
  0x1f   :  { %1137 = dma.done.wait [#allocation3], 896  }
  0x20   :  { %1138 = vsyncadd [#allocation3], 4294966400 }
  0x21   :  { %44 = sfence }
  0x22   :  { %v46_v0 = vld [vmem:[%s1297_s1] sm:$0xff]  ;;  %s52_s9 = sld [smem:[#allocation2]]  ;;  %s1003_s10 = sld [smem:[#allocation2 + $0x1]]  ;;  %v47_v2 = vld [vmem:[%s1297_s1 + $0x8] sm:$0xff]  ;;  %v1145_v5 = vmov 0   ;;  %v80_v12 = vlaneseq  ;;  %vm100_vm0 = vcmask 1042432  }
  0x23   :  { %v48_v1 = vmul.f32 0.01, %v46_v0  ;;  %s1004_s11 = sld [smem:[#allocation2 + $0x2]]  ;;  %v49_v4 = vmul.f32 0.01, %v47_v2  ;;  %177 = vmatprep.mubr.bf16.mxu0 %v1145_v5  ;;  %220 = vmatprep.mubr.bf16.mxu1 %v1145_v5  ;;  %s1005_s2 = sld [smem:[#allocation2 + $0x3]]  ;;  %v74_v28 = vcombine.high %v46_v0, %v46_v0  ;;  %v75_v30 = vcombine.high %v47_v2, %v47_v2 }
  0x24   :  { %1042 = vset.pattern.permute.xlu0 %v1145_v5  ;;  %v1207_v6 = vld [vmem:[%s1299_s3] sm:$0xff]  ;;  %v1213_v8 = vld [vmem:[%s1299_s3 + $0x8] sm:$0xff]  ;;  %v1216_v18 = vshrl.u32 %v80_v12, 7  ;;  %vm132_vm1 = vcmask 1041408   ;;  %vm128_vm2 = vcmask 31744   ;;  %v1146_v46 = vmov 1  }
  0x25   :  { %v1001_v3 = vadd.f32 -0.5, %v48_v1  ;;  %v1002_v7 = vadd.f32 -0.5, %v49_v4  ;;  %115 = vperm.xlu0 %1042, %v1207_v6   ;;  %v1057_v45 = vld [vmem:[#allocation6] sm:$0xff]   ;;  %1043 = vset.pattern.permute.xlu1 %v1146_v46  ;;  %vm259_vm3 = vcmask 130048  }
  0x26   :  { %v1219_v24 = vsub.s32 2, %v1216_v18  ;;  %v86_v25 = vsub.s32 6, %v1216_v18  ;;  %247 = vperm.xlu1 %1043, %v1207_v6  }
  0x28   :  { %v53_v9 = vstv %s52_s9  ;;  %v57_v10 = vstv %s1003_s10 }
  0x29   :  { %v54_v11 = vmul.f32 %v1001_v3, %v53_v9  ;;  %v55_v13 = vmul.f32 %v1002_v7, %v53_v9  ;;  %120 = vperm.xlu0 %1042, %v1213_v8   ;;  %v63_v16 = vstv %s1004_s11  ;;  %v67_v20 = vstv %s1005_s2 }
  0x2a   :  { %251 = vperm.xlu1 %1043, %v1213_v8  }
  0x2b   :  { %v58_v14 = vadd.f32 %v57_v10, %v54_v11  ;;  %v59_v15 = vadd.f32 %v57_v10, %v55_v13 }
  0x2d   :  { %v60_v17 = vmax.f32 %v58_v14, 0.0  ;;  %v61_v19 = vmax.f32 %v59_v15, 0.0 }
  0x2f   :  { %v64_v21 = vmul.f32 %v63_v16, %v60_v17  ;;  %v65_v22 = vmul.f32 %v63_v16, %v61_v19  ;;  %v1058_v16 = vld [vmem:[#allocation6 + $0x8] sm:$0xff]   ;;  %v1147_v17 = vmov 2  }
  0x30   :  { %1044 = vset.pattern.permute.xlu0 %v1147_v17  ;;  %1045 = vset.pattern.permute.xlu1 %v1147_v17 }
  0x31   :  { %v68_v23 = vadd.f32 %v67_v20, %v64_v21  ;;  %v69_v26 = vadd.f32 %v67_v20, %v65_v22  ;;  %365 = vperm.xlu0 %1044, %v1207_v6   ;;  %369 = vperm.xlu1 %1045, %v1213_v8  }
  0x33   :  { %v70_v27 = vmax.f32 %v68_v23, 0.0  ;;  %v71_v29 = vmax.f32 %v69_v26, 0.0 }
  0x35   :  { %v1222_v31 = vrot.slane %v70_v27, %v86_v25  ;;  %v1224_v32 = vrot.slane %v71_v29, %v86_v25  ;;  %v1227_v33 = vrot.slane %v70_v27, %v1219_v24  ;;  %v1230_v34 = vrot.slane %v71_v29, %v1219_v24 }
  0x37   :  { %v102_v35 = vsel %vm100_vm0, %v74_v28, %v1222_v31  ;;  %v104_v36 = vsel %vm100_vm0, %v75_v30, %v1224_v32  ;;  %v101_v37 = vsel %vm100_vm0, %v46_v0, %v1227_v33  ;;  %v103_v38 = vsel %vm100_vm0, %v47_v2, %v1230_v34 }
  0x38   :  { %v106_v39 = vpack.c.bf16 %v102_v35, %v102_v35  ;;  %v108_v40 = vpack.c.bf16 %v104_v36, %v104_v36  ;;  %v105_v41 = vpack.c.bf16 %v101_v37, %v101_v37  ;;  %v107_v42 = vpack.c.bf16 %v103_v38, %v103_v38 }
  0x3a   :  { %1007 = vmatprep.subr.msk.bf16.mxu0 %vm132_vm1, %v106_v39  ;;  %1009 = vmatprep.subr.msk.bf16.mxu1 %vm132_vm1, %v108_v40  ;;  %v134_v43 = vsel %vm132_vm1, %v105_v41, 0  ;;  %v140_v44 = vsel %vm132_vm1, %v107_v42, 0 }
  0x3b   :  { %146 = vmatpush1.bf16.msra.mxu0 %v134_v43  ;;  %189 = vmatpush1.bf16.msra.mxu1 %v140_v44 }
  0x3e   :  { %1008 = vmatmul.mubr.msk.bf16.vlgmr.msra.gmra.mrb[0].mxu0 %vm128_vm2, %v1057_v45  ;;  %1010 = vmatmul.mubr.msk.bf16.vlgmr.msra.gmra.mrb[0].mxu1 %vm128_vm2, %v1057_v45 }
  0x3f   :  { %295 = vmatprep.mubr.bf16.mxu0 %v1145_v5  ;;  %338 = vmatprep.mubr.bf16.mxu1 %v1145_v5 }
  0xa4   :  { %v116_v47 = vpop.permute.xlu0 %115 }
  0xa5   :  { %v248_v19 = vpop.permute.xlu1 %247 }
  0xa8   :  { %v121_v48 = vpop.permute.xlu0 %120 }
  0xa9   :  { %v252_v20 = vpop.permute.xlu1 %251 }
 0x111   :  { %v179_v49 = vpop.f32.mrb[0].mxu0  ;;  %v222_v50 = vpop.f32.mrb[0].mxu1 }
 0x112   :  { %v180_v51 = vadd.f32 %v179_v49, %v116_v47  ;;  %v223_v52 = vadd.f32 %v222_v50, %v116_v47  ;;  %v181_v53 = vpop.f32.mrb[1].mxu0  ;;  %v224_v54 = vpop.f32.mrb[1].mxu1 }
 0x113   :  { %v182_v55 = vadd.f32 %v181_v53, %v116_v47  ;;  %v225_v56 = vadd.f32 %v224_v54, %v116_v47  ;;  %v183_v57 = vpop.f32.mrb[2].mxu0  ;;  %v226_v58 = vpop.f32.mrb[2].mxu1  ;;  %v1059_v54 = vld [vmem:[#allocation6 + $0x10] sm:$0xff]  }
 0x114   :  { %v184_v59 = vadd.f32 %v183_v57, %v121_v48  ;;  %v227_v60 = vadd.f32 %v226_v58, %v121_v48  ;;  %v185_v61 = vpop.f32.mrb[3].mxu0  ;;  %v228_v62 = vpop.f32.mrb[3].mxu1  ;;  %v231_v1 = vmax.f32 %v180_v51, 0.0  ;;  %v233_v2 = vmax.f32 %v223_v52, 0.0 }
 0x115   :  { %v186_v63 = vadd.f32 %v185_v61, %v121_v48  ;;  %v229_v0 = vadd.f32 %v228_v62, %v121_v48  ;;  %v232_v7 = vmax.f32 %v182_v55, 0.0  ;;  %v234_v9 = vmax.f32 %v225_v56, 0.0  ;;  %v366_v56 = vpop.permute.xlu0 %365  ;;  %v370_v57 = vpop.permute.xlu1 %369 }
 0x116   :  { %v235_v3 = vmax.f32 %v184_v59, 0.0  ;;  %v237_v4 = vmax.f32 %v227_v60, 0.0  ;;  %v1148_v55 = vmov 3  }
 0x117   :  { %v236_v10 = vmax.f32 %v186_v63, 0.0  ;;  %v238_v11 = vmax.f32 %v229_v0, 0.0  ;;  %1046 = vset.pattern.permute.xlu1 %v1148_v55  ;;  %1047 = vset.pattern.permute.xlu0 %v1148_v55 }
 0x118   :  { %v242_v12 = vpack.c.bf16 %v235_v3, %v231_v1  ;;  %v244_v13 = vpack.c.bf16 %v237_v4, %v233_v2  ;;  %482 = vperm.xlu1 %1046, %v1207_v6   ;;  %486 = vperm.xlu0 %1047, %v1213_v8  }
 0x119   :  { %v243_v14 = vpack.c.bf16 %v236_v10, %v232_v7  ;;  %v245_v15 = vpack.c.bf16 %v238_v11, %v234_v9 }
 0x11b   :  { %263 = vmatprep.subr.bf16.mxu0 %v243_v14  ;;  %306 = vmatprep.subr.bf16.mxu1 %v245_v15 }
 0x11c   :  { %264 = vmatpush1.bf16.msra.mxu0 %v242_v12  ;;  %307 = vmatpush1.bf16.msra.mxu1 %v244_v13 }
 0x11f   :  { %1012 = vmatmul.mubr.msk.bf16.vlgmr.msra.gmra.mrb[4].mxu0 %vm259_vm3, %v1058_v16  ;;  %1013 = vmatmul.mubr.msk.bf16.vlgmr.msra.gmra.mrb[4].mxu1 %vm259_vm3, %v1058_v16 }
 0x120   :  { %412 = vmatprep.mubr.bf16.mxu0 %v1145_v5  ;;  %455 = vmatprep.mubr.bf16.mxu1 %v1145_v5 }
 0x1f2   :  { %v297_v21 = vpop.f32.mrb[4].mxu0  ;;  %v340_v22 = vpop.f32.mrb[4].mxu1 }
 0x1f3   :  { %v298_v23 = vadd.f32 %v297_v21, %v248_v19  ;;  %v341_v25 = vadd.f32 %v340_v22, %v248_v19  ;;  %v299_v26 = vpop.f32.mrb[5].mxu0  ;;  %v342_v27 = vpop.f32.mrb[5].mxu1 }
 0x1f4   :  { %v300_v28 = vadd.f32 %v299_v26, %v248_v19  ;;  %v343_v29 = vadd.f32 %v342_v27, %v248_v19  ;;  %v301_v30 = vpop.f32.mrb[6].mxu0  ;;  %v344_v35 = vpop.f32.mrb[6].mxu1  ;;  %v1060_v27 = vld [vmem:[#allocation6 + $0x18] sm:$0xff]  }
 0x1f5   :  { %v302_v36 = vadd.f32 %v301_v30, %v252_v20  ;;  %v345_v37 = vadd.f32 %v344_v35, %v252_v20  ;;  %v303_v38 = vpop.f32.mrb[7].mxu0  ;;  %v346_v39 = vpop.f32.mrb[7].mxu1  ;;  %v349_v42 = vmax.f32 %v298_v23, 0.0  ;;  %v351_v43 = vmax.f32 %v341_v25, 0.0 }
 0x1f6   :  { %v304_v40 = vadd.f32 %v303_v38, %v252_v20  ;;  %v347_v41 = vadd.f32 %v346_v39, %v252_v20  ;;  %v350_v46 = vmax.f32 %v300_v28, 0.0  ;;  %v352_v47 = vmax.f32 %v343_v29, 0.0  ;;  %v483_v30 = vpop.permute.xlu1 %482  ;;  %v487_v35 = vpop.permute.xlu0 %486 }
 0x1f7   :  { %v353_v44 = vmax.f32 %v302_v36, 0.0  ;;  %v355_v45 = vmax.f32 %v345_v37, 0.0  ;;  %v1149_v28 = vmov 6   ;;  %v1150_v29 = vmov 4  }
 0x1f8   :  { %v354_v48 = vmax.f32 %v304_v40, 0.0  ;;  %v356_v49 = vmax.f32 %v347_v41, 0.0  ;;  %1048 = vset.pattern.permute.xlu1 %v1149_v28  ;;  %1049 = vset.pattern.permute.xlu0 %v1150_v29 }
 0x1f9   :  { %v360_v50 = vpack.c.bf16 %v353_v44, %v349_v42  ;;  %v362_v51 = vpack.c.bf16 %v355_v45, %v351_v43  ;;  %599 = vperm.xlu1 %1048, %v1207_v6   ;;  %725 = vperm.xlu0 %1049, %v1207_v6  }
 0x1fa   :  { %v361_v52 = vpack.c.bf16 %v354_v48, %v350_v46  ;;  %v363_v53 = vpack.c.bf16 %v356_v49, %v352_v47 }
 0x1fc   :  { %380 = vmatprep.subr.bf16.mxu0 %v361_v52  ;;  %423 = vmatprep.subr.bf16.mxu1 %v363_v53 }
 0x1fd   :  { %381 = vmatpush1.bf16.msra.mxu0 %v360_v50  ;;  %424 = vmatpush1.bf16.msra.mxu1 %v362_v51 }
 0x1fe   :  { %603 = vperm.xlu1 %1048, %v1213_v8  }
 0x200   :  { %1015 = vmatmul.mubr.msk.bf16.vlgmr.msra.gmra.mrb[8].mxu0 %vm259_vm3, %v1059_v54  ;;  %1016 = vmatmul.mubr.msk.bf16.vlgmr.msra.gmra.mrb[8].mxu1 %vm259_vm3, %v1059_v54 }
 0x201   :  { %529 = vmatprep.mubr.bf16.mxu0 %v1145_v5  ;;  %572 = vmatprep.mubr.bf16.mxu1 %v1145_v5 }
 0x202   :  { %1050 = vset.pattern.permute.xlu1 %v1150_v29 }
 0x203   :  { %729 = vperm.xlu1 %1050, %v1213_v8  }
 0x2d3   :  { %v414_v58 = vpop.f32.mrb[8].mxu0  ;;  %v457_v59 = vpop.f32.mrb[8].mxu1 }
 0x2d4   :  { %v415_v60 = vadd.f32 %v414_v58, %v366_v56  ;;  %v458_v61 = vadd.f32 %v457_v59, %v366_v56  ;;  %v416_v62 = vpop.f32.mrb[9].mxu0  ;;  %v459_v63 = vpop.f32.mrb[9].mxu1 }
 0x2d5   :  { %v417_v0 = vadd.f32 %v416_v62, %v366_v56  ;;  %v460_v1 = vadd.f32 %v459_v63, %v366_v56  ;;  %v418_v2 = vpop.f32.mrb[10].mxu0  ;;  %v461_v3 = vpop.f32.mrb[10].mxu1 }
 0x2d6   :  { %v419_v4 = vadd.f32 %v418_v2, %v370_v57  ;;  %v462_v7 = vadd.f32 %v461_v3, %v370_v57  ;;  %v420_v9 = vpop.f32.mrb[11].mxu0  ;;  %v463_v10 = vpop.f32.mrb[11].mxu1  ;;  %v466_v13 = vmax.f32 %v415_v60, 0.0  ;;  %v468_v14 = vmax.f32 %v458_v61, 0.0 }
 0x2d7   :  { %v421_v11 = vadd.f32 %v420_v9, %v370_v57  ;;  %v464_v12 = vadd.f32 %v463_v10, %v370_v57  ;;  %v467_v17 = vmax.f32 %v417_v0, 0.0  ;;  %v469_v19 = vmax.f32 %v460_v1, 0.0  ;;  %v1061_v0 = vld [vmem:[#allocation6 + $0x20] sm:$0xff]   ;;  %v600_v2 = vpop.permute.xlu1 %599 }
 0x2d8   :  { %v470_v15 = vmax.f32 %v419_v4, 0.0  ;;  %v472_v16 = vmax.f32 %v462_v7, 0.0  ;;  %v1151_v1 = vmov 5   ;;  %v609_v4 = vrot.slane %v1227_v33, %v1219_v24 }
 0x2d9   :  { %v471_v20 = vmax.f32 %v421_v11, 0.0  ;;  %v473_v21 = vmax.f32 %v464_v12, 0.0  ;;  %1051 = vset.pattern.permute.xlu1 %v1151_v1  ;;  %1052 = vset.pattern.permute.xlu0 %v1151_v1  ;;  %v617_v7 = vrot.slane %v1230_v34, %v1219_v24  ;;  %v613_v9 = vrot.slane %v1222_v31, %v1219_v24 }
 0x2da   :  { %v477_v22 = vpack.c.bf16 %v470_v15, %v466_v13  ;;  %v479_v23 = vpack.c.bf16 %v472_v16, %v468_v14  ;;  %756 = vperm.xlu1 %1051, %v1207_v6   ;;  %760 = vperm.xlu0 %1052, %v1213_v8   ;;  %v621_v10 = vrot.slane %v1224_v32, %v1219_v24  ;;  %v726_v13 = vpop.permute.xlu0 %725 }
 0x2db   :  { %v478_v25 = vpack.c.bf16 %v471_v20, %v467_v17  ;;  %v480_v26 = vpack.c.bf16 %v473_v21, %v469_v19  ;;  %v604_v3 = vpop.permute.xlu1 %603  ;;  %v622_v11 = vmul.f32 %v609_v4, %v600_v2  ;;  %v624_v12 = vmul.f32 %v617_v7, %v600_v2 }
 0x2dc   :  { %v623_v15 = vmul.f32 %v613_v9, %v600_v2  ;;  %v625_v16 = vmul.f32 %v621_v10, %v600_v2  ;;  %v626_v21 = vmul.f32 %v609_v4, %v604_v3  ;;  %v628_v34 = vmul.f32 %v617_v7, %v604_v3 }
 0x2dd   :  { %497 = vmatprep.subr.bf16.mxu0 %v478_v25  ;;  %540 = vmatprep.subr.bf16.mxu1 %v480_v26  ;;  %v627_v26 = vmul.f32 %v613_v9, %v604_v3  ;;  %v629_v24 = vmul.f32 %v621_v10, %v604_v3 }
 0x2de   :  { %498 = vmatpush1.bf16.msra.mxu0 %v477_v22  ;;  %541 = vmatpush1.bf16.msra.mxu1 %v479_v23 }
 0x2df   :  { %v730_v6 = vpop.permute.xlu1 %729 }
 0x2e1   :  { %1018 = vmatmul.mubr.msk.bf16.vlgmr.msra.gmra.mrb[12].mxu0 %vm259_vm3, %v1060_v27  ;;  %1019 = vmatmul.mubr.msk.bf16.vlgmr.msra.gmra.mrb[12].mxu1 %vm259_vm3, %v1060_v27 }
 0x2e2   :  { %670 = vmatprep.mubr.bf16.mxu0 %v1145_v5  ;;  %713 = vmatprep.mubr.bf16.mxu1 %v1145_v5 }
 0x3b4   :  { %v531_v36 = vpop.f32.mrb[12].mxu0  ;;  %v574_v37 = vpop.f32.mrb[12].mxu1 }
 0x3b5   :  { %v532_v38 = vadd.f32 %v531_v36, %v483_v30  ;;  %v575_v39 = vadd.f32 %v574_v37, %v483_v30  ;;  %v533_v40 = vpop.f32.mrb[13].mxu0  ;;  %v576_v41 = vpop.f32.mrb[13].mxu1 }
 0x3b6   :  { %v534_v42 = vadd.f32 %v533_v40, %v483_v30  ;;  %v577_v43 = vadd.f32 %v576_v41, %v483_v30  ;;  %v535_v44 = vpop.f32.mrb[14].mxu0  ;;  %v578_v45 = vpop.f32.mrb[14].mxu1 }
 0x3b7   :  { %v536_v46 = vadd.f32 %v535_v44, %v487_v35  ;;  %v579_v47 = vadd.f32 %v578_v45, %v487_v35  ;;  %v537_v48 = vpop.f32.mrb[15].mxu0  ;;  %v580_v49 = vpop.f32.mrb[15].mxu1  ;;  %v583_v52 = vmax.f32 %v532_v38, 0.0  ;;  %v585_v53 = vmax.f32 %v575_v39, 0.0 }
 0x3b8   :  { %v538_v50 = vadd.f32 %v537_v48, %v487_v35  ;;  %v581_v51 = vadd.f32 %v580_v49, %v487_v35  ;;  %v584_v56 = vmax.f32 %v534_v42, 0.0  ;;  %v586_v57 = vmax.f32 %v577_v43, 0.0 }
 0x3b9   :  { %v587_v54 = vmax.f32 %v536_v46, 0.0  ;;  %v589_v55 = vmax.f32 %v579_v47, 0.0 }
 0x3ba   :  { %v588_v58 = vmax.f32 %v538_v50, 0.0  ;;  %v590_v59 = vmax.f32 %v581_v51, 0.0 }
 0x3bb   :  { %v594_v60 = vpack.c.bf16 %v587_v54, %v583_v52  ;;  %v596_v61 = vpack.c.bf16 %v589_v55, %v585_v53 }
 0x3bc   :  { %v595_v62 = vpack.c.bf16 %v588_v58, %v584_v56  ;;  %v597_v63 = vpack.c.bf16 %v590_v59, %v586_v57  ;;  %v1062_v56 = vld [vmem:[#allocation6 + $0x28] sm:$0xff]   ;;  %v871_v57 = vld [vmem:[%s1299_s3] sm:$0x3]  ;;  %v1152_v58 = vmov 7   ;;  %v757_v59 = vpop.permute.xlu1 %756  ;;  %s1154_s3 = smov [#allocation7]  }
 0x3bd   :  { %1053 = vset.pattern.permute.xlu1 %v1152_v58  ;;  %1054 = vset.pattern.permute.xlu0 %v1152_v58  ;;  %s991_s19 = sshll.u32 %s1154_s3, 4  ;;  %s992_s19 = int_to_ptr.vmem [resolvable:$true] %s991_s19 }
 0x3be   :  { %638 = vmatprep.subr.bf16.mxu0 %v595_v62  ;;  %681 = vmatprep.subr.bf16.mxu1 %v597_v63  ;;  %s1113_s20 = scalar_lea.vmem %s992_s19, 128  ;;  %p1118_p0 = scmp.lt.s32.totalorder %s992_s19, %s992_s19 }
 0x3bf   :  { %639 = vmatpush1.bf16.msra.mxu0 %v594_v60  ;;  %682 = vmatpush1.bf16.msra.mxu1 %v596_v61  ;;  %v761_v60 = vpop.permute.xlu0 %760  ;;  %p1114_p13 = scmp.ne.s32.totalorder %s992_s19, %s1113_s20  ;;  %p1119_p1 = scmp.lt.s32.totalorder %s1113_s20, %s1113_s20 }
 0x3c0   :  { %874 = vperm.xlu1 %1053, %v871_v57  }
 0x3c1   :  { %p1120_p2 = por %p1119_p1, %p1118_p0 }
 0x3c2   :  { %1021 = vmatmul.mubr.msk.bf16.vlgmr.msra.gmra.mrb[16].mxu0 %vm259_vm3, %v1061_v0  ;;  %1022 = vmatmul.mubr.msk.bf16.vlgmr.msra.gmra.mrb[16].mxu1 %vm259_vm3, %v1061_v0 }
 0x3c3   :  { %803 = vmatprep.mubr.bf16.mxu0 %v1145_v5  ;;  %846 = vmatprep.mubr.bf16.mxu1 %v1145_v5  ;;  %p1121_p3 = pnand %p1120_p2, %p1114_p13 }
 0x495   :  { %v672_v14 = vpop.f32.mrb[16].mxu0  ;;  %v715_v8 = vpop.f32.mrb[16].mxu1 }
 0x496   :  { %v673_v17 = vadd.f32 %v672_v14, %v622_v11  ;;  %v716_v19 = vadd.f32 %v715_v8, %v624_v12  ;;  %v674_v33 = vpop.f32.mrb[17].mxu0  ;;  %v717_v20 = vpop.f32.mrb[17].mxu1 }
 0x497   :  { %v675_v22 = vadd.f32 %v674_v33, %v623_v15  ;;  %v718_v23 = vadd.f32 %v717_v20, %v625_v16  ;;  %v676_v31 = vpop.f32.mrb[18].mxu0  ;;  %v719_v25 = vpop.f32.mrb[18].mxu1 }
 0x498   :  { %v732_v32 = vadd.f32 %v726_v13, %v673_v17  ;;  %v734_v27 = vadd.f32 %v726_v13, %v716_v19  ;;  %v677_v28 = vadd.f32 %v676_v31, %v626_v21  ;;  %v720_v29 = vadd.f32 %v719_v25, %v628_v34  ;;  %v678_v30 = vpop.f32.mrb[19].mxu0  ;;  %v721_v35 = vpop.f32.mrb[19].mxu1  ;;  %v866_v31 = vld [vmem:[#allocation6 + $0x30] sm:$0x1] }
 0x499   :  { %v733_v36 = vadd.f32 %v726_v13, %v675_v22  ;;  %v735_v37 = vadd.f32 %v726_v13, %v718_v23  ;;  %v679_v38 = vadd.f32 %v678_v30, %v627_v26  ;;  %v722_v39 = vadd.f32 %v721_v35, %v629_v24  ;;  %v875_v24 = vpop.permute.xlu1 %874 }
 0x49a   :  { %v736_v40 = vadd.f32 %v730_v6, %v677_v28  ;;  %v738_v41 = vadd.f32 %v730_v6, %v720_v29  ;;  %v740_v44 = vmax.f32 %v732_v32, 0.0  ;;  %v742_v45 = vmax.f32 %v734_v27, 0.0 }
 0x49b   :  { %v737_v42 = vadd.f32 %v730_v6, %v679_v38  ;;  %v739_v43 = vadd.f32 %v730_v6, %v722_v39  ;;  %v741_v48 = vmax.f32 %v733_v36, 0.0  ;;  %v743_v50 = vmax.f32 %v735_v37, 0.0 }
 0x49c   :  { %v744_v46 = vmax.f32 %v736_v40, 0.0  ;;  %v746_v47 = vmax.f32 %v738_v41, 0.0  ;;  %v1153_v25 = vmov 1983009808  }
 0x49d   :  { %v745_v49 = vmax.f32 %v737_v42, 0.0  ;;  %v747_v51 = vmax.f32 %v739_v43, 0.0  ;;  %v969_v26 = vunpack.c.l.s4 %v1153_v25 }
 0x49e   :  { %v751_v52 = vpack.c.bf16 %v744_v46, %v740_v44  ;;  %v753_v53 = vpack.c.bf16 %v746_v47, %v742_v45 }
 0x49f   :  { %v752_v54 = vpack.c.bf16 %v745_v49, %v741_v48  ;;  %v754_v55 = vpack.c.bf16 %v747_v51, %v743_v50  ;;  %v970_v32 = vunpack.c.0.s8 %v969_v26 }
 0x4a1   :  { %771 = vmatprep.subr.bf16.mxu0 %v752_v54  ;;  %814 = vmatprep.subr.bf16.mxu1 %v754_v55  ;;  %v973_v39 = vsub.s32 %v970_v32, %v1216_v18 }
 0x4a2   :  { %772 = vmatpush1.bf16.msra.mxu0 %v751_v52  ;;  %815 = vmatpush1.bf16.msra.mxu1 %v753_v53 }
 0x4a5   :  { %1024 = vmatmul.mubr.msk.bf16.vlgmr.msra.gmra.mrb[20].mxu0 %vm259_vm3, %v1062_v56  ;;  %1025 = vmatmul.mubr.msk.bf16.vlgmr.msra.gmra.mrb[20].mxu1 %vm259_vm3, %v1062_v56 }
 0x4a6   :  { %912 = vmatprep.mubr.bf16.mxu0 %v1145_v5  ;;  %953 = vmatprep.mubr.bf16.mxu1 %v1145_v5 }
 0x578   :  { %v805_v61 = vpop.f32.mrb[20].mxu0  ;;  %v848_v62 = vpop.f32.mrb[20].mxu1 }
 0x579   :  { %v806_v63 = vadd.f32 %v805_v61, %v757_v59  ;;  %v849_v0 = vadd.f32 %v848_v62, %v757_v59  ;;  %v807_v1 = vpop.f32.mrb[21].mxu0  ;;  %v850_v2 = vpop.f32.mrb[21].mxu1 }
 0x57a   :  { %v808_v3 = vadd.f32 %v807_v1, %v757_v59  ;;  %v851_v4 = vadd.f32 %v850_v2, %v757_v59  ;;  %v809_v7 = vpop.f32.mrb[22].mxu0  ;;  %v852_v5 = vpop.f32.mrb[22].mxu1 }
 0x57b   :  { %1063 = vtanh.f32 %v806_v63  ;;  %v810_v9 = vadd.f32 %v809_v7, %v761_v60  ;;  %v811_v10 = vpop.f32.mrb[23].mxu0  ;;  %v854_v11 = vpop.f32.mrb[23].mxu1  ;;  %v853_v12 = vadd.f32 %v852_v5, %v761_v60 }
 0x57c   :  { %1065 = vtanh.f32 %v849_v0  ;;  %v812_v13 = vadd.f32 %v811_v10, %v761_v60  ;;  %v855_v6 = vadd.f32 %v854_v11, %v761_v60 }
 0x57d   :  { %1067 = vtanh.f32 %v808_v3 }
 0x57e   :  { %1069 = vtanh.f32 %v851_v4 }
 0x57f   :  { %1071 = vtanh.f32 %v810_v9 }
 0x580   :  { %1073 = vtanh.f32 %v853_v12 }
 0x581   :  { %1075 = vtanh.f32 %v812_v13 }
 0x582   :  { %1077 = vtanh.f32 %v855_v6 }
 0x585   :  { %v1064_v14 = vpop.eup %1063 }
 0x586   :  { %v1066_v8 = vpop.eup %1065 }
 0x587   :  { %v1068_v15 = vpop.eup %1067 }
 0x588   :  { %v1070_v16 = vpop.eup %1069 }
 0x589   :  { %v1072_v17 = vpop.eup %1071 }
 0x58a   :  { %v1074_v19 = vpop.eup %1073  ;;  %v867_v33 = vpack.c.bf16 %v1072_v17, %v1064_v14 }
 0x58b   :  { %v1076_v20 = vpop.eup %1075  ;;  %v869_v21 = vpack.c.bf16 %v1074_v19, %v1066_v8 }
 0x58c   :  { %v1078_v34 = vpop.eup %1077  ;;  %v868_v22 = vpack.c.bf16 %v1076_v20, %v1068_v15 }
 0x58d   :  { %v870_v23 = vpack.c.bf16 %v1078_v34, %v1070_v16 }
 0x58e   :  { %880 = vmatprep.subr.bf16.mxu0 %v868_v22 }
 0x58f   :  { %921 = vmatprep.subr.bf16.mxu1 %v870_v23  ;;  %881 = vmatpush1.bf16.msra.mxu0 %v867_v33 }
 0x590   :  { %922 = vmatpush1.bf16.msra.mxu1 %v869_v21 }
 0x592   :  { %1026 = vmatmul.mubr.msk.bf16.vlgmr.msra.gmra.mrb[24].mxu0 %vm259_vm3, %v866_v31 }
 0x593   :  { %1027 = vmatmul.mubr.msk.bf16.vlgmr.msra.gmra.mrb[24].mxu1 %vm259_vm3, %v866_v31 }
 0x665   :  { %v914_v27 = vpop.f32.mrb[24].mxu0 }
 0x666   :  { %v955_v28 = vpop.f32.mrb[24].mxu1  ;;  %v916_v29 = vpop.f32.mrb[25].mxu0  ;;  %v915_v30 = vadd.f32 %v914_v27, %v875_v24 }
 0x667   :  { %v957_v35 = vpop.f32.mrb[25].mxu1  ;;  %v918_v36 = vpop.f32.mrb[26].mxu0  ;;  %v917_v37 = vadd.f32 %v916_v29, %v875_v24  ;;  %v956_v38 = vadd.f32 %v955_v28, %v875_v24 }
 0x668   :  { %v959_v40 = vpop.f32.mrb[26].mxu1  ;;  %v958_v41 = vadd.f32 %v957_v35, %v875_v24  ;;  %v919_v42 = vpop.f32.mrb[27].mxu0 }
 0x669   :  { %v960_v43 = vpop.f32.mrb[27].mxu1  ;;  %v966_v44 = vcombine.low %v915_v30, %v917_v37 }
 0x66a   :  { %v967_v45 = vcombine.low %v956_v38, %v958_v41 }
 0x66b   :  { %v974_v46 = vrot.slane %v966_v44, %v973_v39 }
 0x66c   :  { %v981_v47 = vrot.slane %v967_v45, %v973_v39 }
 0x66e   :  { %v982_v48 = vcombine.low %v974_v46, %v981_v47 }
 0x670   :  { %984 = vst [vmem:[#allocation7] sm:$0xff] %v982_v48 }
 0x671   :  { %1124 = shalt.err (!%p1121_p3)
}
 0x672   :  { %s1125_s23 = scalar_lea.hbm %s1300_s4, 128 }
 0x673   :  { %p1126_p4 = scmp.ne.s32.totalorder %s1300_s4, %s1125_s23  ;;  %p1129_p5 = scmp.lt.u32.totalorder %s1125_s23, %s1300_s4 }
 0x675   :  { %p1131_p6 = pnand %p1129_p5, %p1126_p4 }
 0x677   :  { %1134 = shalt.err (!%p1131_p6)
}
 0x678   :  { %994 = dma.vmem_to_hbm [thread:$0]  %s992_s19, 128, %s1300_s4, [#allocation4]  }
 0x679   :  { %1139 = dma.done.wait [#allocation4], 128  }
 0x67a   :  { %1140 = vsyncadd [#allocation4], 4294967168 }
 0x67b   :  { %998 = vsyncpa [#allocation3], 1 }
 0x67c   :  { %999 = vsyncpa [#allocation4], 1 }
 0x67d   :  { %1000 = vsyncpa [#allocation5], 1 }

</bundles_post_ra>
